<compile_context>
chip_gen: v5e
topology: v5e:2x2
jax: 0.10.0
libtpu: 0.0.40
codegen_flags: <defaults>
</compile_context>

<pallas_src>
import functools

import jax
import jax.numpy as jnp
from jax.experimental import pallas as pl
from jax.experimental.pallas import tpu as pltpu


# -----------------------------------------------------------------------------
# Kernel 1: neighbor aggregation (A @ [L|W|E|T]) + merge_linner + ReLU,
#           plus per-dst-tile BatchNorm partial statistics.
# grid = (dst-node tiles [parallel], src-node tiles [arbitrary reduction])
# -----------------------------------------------------------------------------
def mgn_agg_linner_kernel(H, a_ref, x4_ref, w1_ref, b1_ref,
                          packed_ref, stats_ref, acc_ref):
    k = pl.program_id(1)

    @pl.when(k == 0)
    def _():
        acc_ref[...] = jnp.zeros_like(acc_ref)

    # Fused aggregation of all four features: (TM, TK) bf16 @ (TK, 4H) bf16,
    # accumulated in f32.  acc = [l_agg | w_agg | e_agg | t_agg].
    acc_ref[...] += jnp.dot(a_ref[...], x4_ref[...],
                            preferred_element_type=jnp.float32)

    @pl.when(k == pl.num_programs(1) - 1)
    def _():
        agg = acc_ref[...]                                     # (TM, 4H) f32
        # merge_linner: one K = 4H contraction (weights resident in VMEM).
        x = jnp.dot(agg, w1_ref[...],
                    preferred_element_type=jnp.float32) + b1_ref[...]
        x = jnp.maximum(x, 0.0)                                # ReLU
        # Lane-dense packed output: [x | w_agg | e_agg | t_agg]  (TM, 4H).
        packed_ref[...] = jnp.concatenate([x, agg[:, H:]], axis=-1)
        # Per-tile BatchNorm partial statistics (finalized in the wrapper).
        ssum = jnp.sum(x, axis=0, keepdims=True)               # (1, H)
        ssq = jnp.sum(x * x, axis=0, keepdims=True)            # (1, H)
        stats_ref[...] = jnp.concatenate([ssum, ssq], axis=0)[None, :, :]


# -----------------------------------------------------------------------------
# Kernel 2: apply BatchNorm affine (scale/shift precomputed from global stats)
#           fused with merge_hidden; re-emit a lane-dense packed slab.
# grid = (dst-node tiles [parallel],)
# -----------------------------------------------------------------------------
def mgn_bn_hidden_kernel(H, packed_ref, scale_ref, shift_ref, w2_ref, b2_ref,
                         out_ref):
    tile = packed_ref[...]                                     # (TM, 4H)
    x = tile[:, :H]                                            # relu(linner(h))
    y = x * scale_ref[...] + shift_ref[...]                    # BatchNorm
    l_new = jnp.dot(y, w2_ref[...],
                    preferred_element_type=jnp.float32) + b2_ref[...]
    out_ref[...] = jnp.concatenate([l_new, tile[:, H:]], axis=-1)


def mgn_forward(A, L, W, E, T, params, *, dst_tile=256, src_tile=512, eps=1e-5):
    """MGN forward. Returns dict matching the DGL node data after update_all."""
    N, H = L.shape
    H4 = 4 * H

    # Lane-dense stacked features; bf16 feeds the MXU natively and halves DMA
    # traffic.  A is {0,1}, so its bf16 cast is exact.
    x4 = jnp.concatenate([L, W, E, T], axis=-1).astype(jnp.bfloat16)   # (N, 4H)
    a_bf = A.astype(jnp.bfloat16)                                      # (N, N)

    # PyTorch Linear stores (out, in) and computes x @ W^T + b.
    w1_t = params["merge_linner_w"].T.astype(jnp.float32)              # (4H, H)
    b1 = params["merge_linner_b"].reshape(1, H).astype(jnp.float32)
    w2_t = params["merge_hidden_w"].T.astype(jnp.float32)              # (H, H)
    b2 = params["merge_hidden_b"].reshape(1, H).astype(jnp.float32)
    gamma = params["bn_gamma"].astype(jnp.float32)                     # (H,)
    beta = params["bn_beta"].astype(jnp.float32)                       # (H,)

    # Tile sizes bounded for v7x's smaller VMEM; full extent for small graphs.
    # (When a tile is smaller than the array, it is a multiple of (8, 128).)
    tm = min(dst_tile, N)
    tk = min(src_tile, N)
    assert N % tm == 0 and N % tk == 0, "N must be divisible by the tile sizes"
    gm, gk = N // tm, N // tk

    kern1 = functools.partial(mgn_agg_linner_kernel, H)
    packed1, stats = pl.pallas_call(
        kern1,
        out_shape=(jax.ShapeDtypeStruct((N, H4), jnp.float32),
                   jax.ShapeDtypeStruct((gm, 2, H), jnp.float32)),
        grid_spec=pltpu.PrefetchScalarGridSpec(
            num_scalar_prefetch=0,
            grid=(gm, gk),
            in_specs=[
                pl.BlockSpec((tm, tk), lambda i, k: (i, k)),       # A tile
                pl.BlockSpec((tk, H4), lambda i, k: (k, 0)),       # [L|W|E|T]
                pl.BlockSpec((H4, H), lambda i, k: (0, 0)),        # W1 resident
                pl.BlockSpec((1, H), lambda i, k: (0, 0)),         # b1 resident
            ],
            out_specs=(
                pl.BlockSpec((tm, H4), lambda i, k: (i, 0)),       # packed slab
                pl.BlockSpec((1, 2, H), lambda i, k: (i, 0, 0)),   # BN partials
            ),
            scratch_shapes=[pltpu.VMEM((tm, H4), jnp.float32)],
        ),
        compiler_params=pltpu.CompilerParams(
            dimension_semantics=("parallel", "arbitrary"),
            vmem_limit_bytes=32 * 1024 * 1024),
    )(a_bf, x4, w1_t, b1)

    # Finalize BatchNorm statistics (tiny (gm, 2, H) -> (H,) reduce); training
    # mode batch statistics with biased variance, matching nn.BatchNorm1d.
    ssum = jnp.sum(stats[:, 0, :], axis=0)
    ssq = jnp.sum(stats[:, 1, :], axis=0)
    mean = ssum / N
    var = jnp.maximum(ssq / N - mean * mean, 0.0)
    scale = (gamma * jax.lax.rsqrt(var + eps)).reshape(1, H)
    shift = (beta - mean * scale[0]).reshape(1, H)

    kern2 = functools.partial(mgn_bn_hidden_kernel, H)
    packed2 = pl.pallas_call(
        kern2,
        out_shape=jax.ShapeDtypeStruct((N, H4), jnp.float32),
        grid_spec=pltpu.PrefetchScalarGridSpec(
            num_scalar_prefetch=0,
            grid=(gm,),
            in_specs=[
                pl.BlockSpec((tm, H4), lambda i: (i, 0)),
                pl.BlockSpec((1, H), lambda i: (0, 0)),            # scale
                pl.BlockSpec((1, H), lambda i: (0, 0)),            # shift
                pl.BlockSpec((H, H), lambda i: (0, 0)),            # W2 resident
                pl.BlockSpec((1, H), lambda i: (0, 0)),            # b2 resident
            ],
            out_specs=pl.BlockSpec((tm, H4), lambda i: (i, 0)),
        ),
        compiler_params=pltpu.CompilerParams(
            dimension_semantics=("parallel",),
            vmem_limit_bytes=32 * 1024 * 1024),
    )(packed1, scale, shift, w2_t, b2)

    # Free layout plumbing: split the lane-dense slab into the DGL node data.
    l_new = packed2[:, 0 * H:1 * H]
    w_agg = packed2[:, 1 * H:2 * H]
    e_agg = packed2[:, 2 * H:3 * H]
    t_agg = packed2[:, 3 * H:4 * H]
    return {
        "l": l_new,
        "w": w_agg.reshape(N, 1, H),
        "e": e_agg.reshape(N, 1, H),
        "t": t_agg.reshape(N, 1, H),
    }


def mgn_reference(A, L, W, E, T, params, eps=1e-5):
    """Pure-JAX f32 reference of the same forward pass."""
    N, H = L.shape
    l_agg, w_agg, e_agg, t_agg = (A @ L, A @ W, A @ E, A @ T)
    h = jnp.concatenate([l_agg, w_agg, e_agg, t_agg], axis=-1)
    x = h @ params["merge_linner_w"].T + params["merge_linner_b"]
    x = jnp.maximum(x, 0.0)
    mean = jnp.mean(x, axis=0)
    var = jnp.mean((x - mean) ** 2, axis=0)
    x = (x - mean) * jax.lax.rsqrt(var + eps) * params["bn_gamma"] + params["bn_beta"]
    l_new = x @ params["merge_hidden_w"].T + params["merge_hidden_b"]
    return {"l": l_new, "w": w_agg.reshape(N, 1, H),
            "e": e_agg.reshape(N, 1, H), "t": t_agg.reshape(N, 1, H)}


if __name__ == "__main__":
    N = 16   # nodes in the (batched) graph
    H = 32   # hidden_dim

    key = jax.random.PRNGKey(0)
    keys = jax.random.split(key, 10)

    # deterministic node features
    L = jax.random.normal(keys[0], (N, H), jnp.float32)
    W = jax.random.normal(keys[1], (N, H), jnp.float32)
    E = jax.random.normal(keys[2], (N, H), jnp.float32)
    T = jax.random.normal(keys[3], (N, H), jnp.float32)

    # deterministic adjacency: ring graph, A[dst, src] = 1 for both neighbors.
    idx = jnp.arange(N)
    A = (jnp.zeros((N, N), jnp.float32)
         .at[idx, (idx + 1) % N].set(1.0)
         .at[idx, (idx - 1) % N].set(1.0))

    # deterministic parameters (shapes follow nn.Linear / nn.BatchNorm1d)
    params = {
        "merge_linner_w": 0.05 * jax.random.normal(keys[4], (H, 4 * H), jnp.float32),
        "merge_linner_b": 0.01 * jax.random.normal(keys[5], (H,), jnp.float32),
        "merge_hidden_w": 0.05 * jax.random.normal(keys[6], (H, H), jnp.float32),
        "merge_hidden_b": 0.01 * jax.random.normal(keys[7], (H,), jnp.float32),
        "bn_gamma": jnp.ones((H,), jnp.float32),
        "bn_beta": jnp.zeros((H,), jnp.float32),
    }

    out = mgn_forward(A, L, W, E, T, params)
    jax.block_until_ready(out)

    assert out["l"].shape == (N, H)
    assert out["w"].shape == (N, 1, H)
    assert out["e"].shape == (N, 1, H)
    assert out["t"].shape == (N, 1, H)

    # correctness vs pure-JAX reference (tolerance covers bf16 aggregation)
    ref = mgn_reference(A, L, W, E, T, params)
    for name in ("l", "w", "e", "t"):
        err = float(jnp.max(jnp.abs(out[name] - ref[name])))
        assert err < 1e-1, (name, err)

    print("KERNEL_OK")
</pallas_src>

<mosaic_0001>
module attributes {stable_mosaic.version = 11 : i64} {
  func.func @mgn_agg_linner_kernel(%arg0: i32, %arg1: i32, %arg2: memref<16x16xbf16, #tpu.memory_space<vmem>>, %arg3: memref<16x128xbf16, #tpu.memory_space<vmem>>, %arg4: memref<128x32xf32, #tpu.memory_space<vmem>>, %arg5: memref<1x32xf32, #tpu.memory_space<vmem>>, %arg6: memref<16x128xf32, #tpu.memory_space<vmem>>, %arg7: memref<1x2x32xf32, #tpu.memory_space<vmem>>, %arg8: memref<16x128xf32, #tpu.memory_space<vmem>>) attributes {dimension_semantics = [#tpu.dimension_semantics<parallel>, #tpu.dimension_semantics<arbitrary>], iteration_bounds = array<i64: 1, 1>, scalar_prefetch = 0 : i64, scratch_operands = 1 : i64, tpu.core_type = #tpu.core_type<tc>, window_params = [{transform_indices = @transform_0, window_bounds = array<i64: 16, 16>}, {transform_indices = @transform_1, window_bounds = array<i64: 16, 128>}, {pipeline_mode = #tpu.pipeline_mode<synchronous>, transform_indices = @transform_2, window_bounds = array<i64: 128, 32>}, {pipeline_mode = #tpu.pipeline_mode<synchronous>, transform_indices = @transform_3, window_bounds = array<i64: 1, 32>}, {transform_indices = @transform_4, window_bounds = array<i64: 16, 128>}, {transform_indices = @transform_5, window_bounds = array<i64: 1, 2, 32>}]} {
    %c0_i32 = arith.constant 0 : i32
    %0 = arith.cmpi eq, %arg1, %c0_i32 : i32
    %1 = arith.extui %0 : i1 to i32
    %c0_i32_0 = arith.constant 0 : i32
    %2 = arith.cmpi ne, %1, %c0_i32_0 : i32
    scf.if %2 {
      %cst_10 = arith.constant 0.000000e+00 : f32
      %12 = vector.broadcast %cst_10 : f32 to vector<16x128xf32>
      %c0_11 = arith.constant 0 : index
      %c0_12 = arith.constant 0 : index
      %13 = vector.load %arg8[%c0_11, %c0_12] : memref<16x128xf32, #tpu.memory_space<vmem>>, vector<16x128xf32>
      tpu.vector_store %arg8[%c0_11, %c0_12], %12 {strides = array<i32>} : memref<16x128xf32, #tpu.memory_space<vmem>>, vector<16x128xf32>,
    } else {
    }
    %c0 = arith.constant 0 : index
    %c0_1 = arith.constant 0 : index
    %3 = vector.load %arg8[%c0, %c0_1] : memref<16x128xf32, #tpu.memory_space<vmem>>, vector<16x128xf32>
    %c0_2 = arith.constant 0 : index
    %c0_3 = arith.constant 0 : index
    %4 = vector.load %arg2[%c0_2, %c0_3] : memref<16x16xbf16, #tpu.memory_space<vmem>>, vector<16x16xbf16>
    %c0_4 = arith.constant 0 : index
    %c0_5 = arith.constant 0 : index
    %5 = vector.load %arg3[%c0_4, %c0_5] : memref<16x128xbf16, #tpu.memory_space<vmem>>, vector<16x128xbf16>
    %cst = arith.constant dense<0.000000e+00> : vector<16x128xf32>
    %6 = tpu.matmul %4, %5, %cst {dimension_numbers = #tpu.dot_dimension_numbers<[1], [0], [0], [1], [0, 0, 1, 1], [], []>} : vector<16x16xbf16>, vector<16x128xbf16>, vector<16x128xf32> -> vector<16x128xf32>
    %7 = arith.addf %3, %6 : vector<16x128xf32>
    %c0_6 = arith.constant 0 : index
    %c0_7 = arith.constant 0 : index
    %8 = vector.load %arg8[%c0_6, %c0_7] : memref<16x128xf32, #tpu.memory_space<vmem>>, vector<16x128xf32>
    tpu.vector_store %arg8[%c0_6, %c0_7], %7 {strides = array<i32>} : memref<16x128xf32, #tpu.memory_space<vmem>>, vector<16x128xf32>,
    %c0_i32_8 = arith.constant 0 : i32
    %9 = arith.cmpi eq, %arg1, %c0_i32_8 : i32
    %10 = arith.extui %9 : i1 to i32
    %c0_i32_9 = arith.constant 0 : i32
    %11 = arith.cmpi ne, %10, %c0_i32_9 : i32
    scf.if %11 {
      %c0_10 = arith.constant 0 : index
      %c0_11 = arith.constant 0 : index
      %12 = vector.load %arg8[%c0_10, %c0_11] : memref<16x128xf32, #tpu.memory_space<vmem>>, vector<16x128xf32>
      %c0_12 = arith.constant 0 : index
      %c0_13 = arith.constant 0 : index
      %13 = vector.load %arg4[%c0_12, %c0_13] : memref<128x32xf32, #tpu.memory_space<vmem>>, vector<128x32xf32>
      %cst_14 = arith.constant dense<0.000000e+00> : vector<16x32xf32>
      %14 = tpu.matmul %12, %13, %cst_14 {dimension_numbers = #tpu.dot_dimension_numbers<[1], [0], [0], [1], [0, 0, 1, 1], [], []>} : vector<16x128xf32>, vector<128x32xf32>, vector<16x32xf32> -> vector<16x32xf32>
      %c0_15 = arith.constant 0 : index
      %c0_16 = arith.constant 0 : index
      %15 = vector.load %arg5[%c0_15, %c0_16] : memref<1x32xf32, #tpu.memory_space<vmem>>, vector<1x32xf32>
      %16 = vector.broadcast %15 : vector<1x32xf32> to vector<16x32xf32>
      %17 = arith.addf %14, %16 : vector<16x32xf32>
      %cst_17 = arith.constant 0.000000e+00 : f32
      %18 = vector.broadcast %cst_17 : f32 to vector<16x32xf32>
      %19 = arith.maximumf %17, %18 : vector<16x32xf32>
      %20 = vector.extract_strided_slice %12 {offsets = [0, 32], sizes = [16, 96], strides = [1, 1]} : vector<16x128xf32> to vector<16x96xf32>
      %21 = tpu.concatenate %19, %20 in 1 : vector<16x32xf32>, vector<16x96xf32> -> vector<16x128xf32>
      %c0_18 = arith.constant 0 : index
      %c0_19 = arith.constant 0 : index
      %22 = vector.load %arg6[%c0_18, %c0_19] : memref<16x128xf32, #tpu.memory_space<vmem>>, vector<16x128xf32>
      tpu.vector_store %arg6[%c0_18, %c0_19], %21 {strides = array<i32>} : memref<16x128xf32, #tpu.memory_space<vmem>>, vector<16x128xf32>,
      %cst_20 = arith.constant dense<0.000000e+00> : vector<32xf32>
      %23 = vector.multi_reduction <add>, %19, %cst_20 [0] : vector<16x32xf32> to vector<32xf32>
      %24 = vector.shape_cast %23 : vector<32xf32> to vector<1x32xf32>
      %25 = arith.mulf %19, %19 : vector<16x32xf32>
      %cst_21 = arith.constant dense<0.000000e+00> : vector<32xf32>
      %26 = vector.multi_reduction <add>, %25, %cst_21 [0] : vector<16x32xf32> to vector<32xf32>
      %27 = vector.shape_cast %26 : vector<32xf32> to vector<1x32xf32>
      %28 = tpu.concatenate %24, %27 in 0 : vector<1x32xf32>, vector<1x32xf32> -> vector<2x32xf32>
      %29 = vector.shape_cast %28 : vector<2x32xf32> to vector<1x2x32xf32>
      %c0_22 = arith.constant 0 : index
      %c0_23 = arith.constant 0 : index
      %c0_24 = arith.constant 0 : index
      %30 = vector.load %arg7[%c0_22, %c0_23, %c0_24] : memref<1x2x32xf32, #tpu.memory_space<vmem>>, vector<1x2x32xf32>
      tpu.vector_store %arg7[%c0_22, %c0_23, %c0_24], %29 {strides = array<i32>} : memref<1x2x32xf32, #tpu.memory_space<vmem>>, vector<1x2x32xf32>,
    } else {
    }
    return
  }
  func.func @transform_0(%arg0: i32, %arg1: i32) -> (i32, i32) {
    %c0_i32 = arith.constant 0 : i32
    return %arg0, %arg1 : i32, i32
  }
  func.func @transform_1(%arg0: i32, %arg1: i32) -> (i32, i32) {
    %c0_i32 = arith.constant 0 : i32
    %c0_i32_0 = arith.constant 0 : i32
    return %arg1, %c0_i32 : i32, i32
  }
  func.func @transform_2(%arg0: i32, %arg1: i32) -> (i32, i32) {
    %c0_i32 = arith.constant 0 : i32
    %c0_i32_0 = arith.constant 0 : i32
    %c0_i32_1 = arith.constant 0 : i32
    return %c0_i32, %c0_i32_0 : i32, i32
  }
  func.func @transform_3(%arg0: i32, %arg1: i32) -> (i32, i32) {
    %c0_i32 = arith.constant 0 : i32
    %c0_i32_0 = arith.constant 0 : i32
    %c0_i32_1 = arith.constant 0 : i32
    return %c0_i32, %c0_i32_0 : i32, i32
  }
  func.func @transform_4(%arg0: i32, %arg1: i32) -> (i32, i32) {
    %c0_i32 = arith.constant 0 : i32
    %c0_i32_0 = arith.constant 0 : i32
    return %arg0, %c0_i32 : i32, i32
  }
  func.func @transform_5(%arg0: i32, %arg1: i32) -> (i32, i32, i32) {
    %c0_i32 = arith.constant 0 : i32
    %c0_i32_0 = arith.constant 0 : i32
    %c0_i32_1 = arith.constant 0 : i32
    return %arg0, %c0_i32, %c0_i32_0 : i32, i32, i32
  }
}

</mosaic_0001>

<bundles_post_ra>
// kernel: tpu_custom_call.1
= control target key start
LH: loop header
LB: loop body
LE: loop exit
PB: predicated region body
PF: predicated region fallthrough
CT: control target
= control target key end

     0   :  { %11 = vsyncpa [#allocation4], 0  ;;  %vm45_vm0 = vcmask 130048   ;;  %s367_s0 = inlined_call_operand.vmem [shape: bf16[16,16], index: 0, kind: input, shape index: {}]   ;;  %s368_s1 = inlined_call_operand.vmem [shape: bf16[16,128], index: 1, kind: input, shape index: {}]   ;;  %s369_s2 = inlined_call_operand.vmem [shape: f32[128,32], index: 2, kind: input, shape index: {}]   ;;  %s370_s3 = inlined_call_operand.vmem [shape: f32[1,32], index: 3, kind: input, shape index: {}]   ;;  %s371_s4 = inlined_call_operand.hbm [shape: f32[16,128], index: 4, kind: output, shape index: {0}]   ;;  %s372_s5 = inlined_call_operand.hbm [shape: f32[1,2,32], index: 5, kind: output, shape index: {1}]  }
   0x1   :  { %v190_v0 = vld [vmem:[%s368_s1] sm:$0xff]  ;;  %v87_v1 = vld [vmem:[%s369_s2 + $0x78] sm:$0xff]  ;;  %v86_v3 = vld [vmem:[%s369_s2 + $0x70] sm:$0xff] }
   0x2   :  { %v189_v2 = vld [vmem:[%s367_s0] sm:$0xff]  ;;  %92 = vmatpush.msra.mxu1 %v87_v1  ;;  %191 = vmatpush.msra.mxu2 %v87_v1  ;;  %v85_v4 = vld [vmem:[%s369_s2 + $0x68] sm:$0xff]  ;;  %v83_v6 = vld [vmem:[%s369_s2 + $0x58] sm:$0xff] }
   0x3   :  { %56 = vmatpush.bf16.msra.mxu0 %v190_v0  ;;  %v84_v5 = vld [vmem:[%s369_s2 + $0x60] sm:$0xff] }
   0x4   :  { %93 = vmatpush.msra.mxu1 %v86_v3  ;;  %192 = vmatpush.msra.mxu2 %v86_v3 }
   0x6   :  { %188 = vmatmul.msk.bf16.vlgmr.msra.gmra.mxu0 %vm45_vm0, %v189_v2  ;;  %94 = vmatpush.msra.mxu1 %v85_v4 }
   0x7   :  { %193 = vmatpush.msra.mxu2 %v85_v4 }
   0x8   :  { %12 = vsyncpa [#allocation6], 0  ;;  %95 = vmatpush.msra.mxu1 %v84_v5  ;;  %v82_v7 = vld [vmem:[%s369_s2 + $0x50] sm:$0xff]  ;;  %v81_v8 = vld [vmem:[%s369_s2 + $0x48] sm:$0xff]  ;;  %vm117_vm1 = vcmask 261120   ;;  %s264_s28 = smov [#allocation3]  }
   0x9   :  { %194 = vmatpush.msra.mxu2 %v84_v5  ;;  %v80_v9 = vld [vmem:[%s369_s2 + $0x40] sm:$0xff]  ;;  %v79_v10 = vld [vmem:[%s369_s2 + $0x38] sm:$0xff]  ;;  %v78_v11 = vld [vmem:[%s369_s2 + $0x30] sm:$0xff]  ;;  %s152_s30 = sshll.u32 %s371_s4, 4  ;;  %s266_s4 = smov 8   ;;  %vm142_vm2 = vcmask 1040384   ;;  %s153_s30 = int_to_ptr.hbm [resolvable:$true] %s152_s30 }
   0xa   :  { %96 = vmatpush.msra.mxu1 %v83_v6  ;;  %v77_v12 = vld [vmem:[%s369_s2 + $0x28] sm:$0xff]  ;;  %v76_v13 = vld [vmem:[%s369_s2 + $0x20] sm:$0xff]  ;;  %v75_v14 = vld [vmem:[%s369_s2 + $0x18] sm:$0xff]  ;;  %s267_s6 = smov [#allocation5]   ;;  %s166_s10 = sshll.u32 %s372_s5, 4  ;;  %vm144_vm3 = vcmask 254976   ;;  %s167_s10 = int_to_ptr.hbm [resolvable:$true] %s166_s10 }
   0xb   :  { %195 = vmatpush.msra.mxu2 %v83_v6  ;;  %v74_v15 = vld [vmem:[%s369_s2 + $0x10] sm:$0xff]  ;;  %v73_v16 = vld [vmem:[%s369_s2 + $0x8] sm:$0xff]  ;;  %v72_v17 = vld [vmem:[%s369_s2] sm:$0xff]  ;;  %s150_s2 = sshll.u32 %s264_s28, 4  ;;  %s164_s7 = sshll.u32 %s267_s6, 4  ;;  %s151_s2 = int_to_ptr.vmem [resolvable:$true] %s150_s2  ;;  %s165_s7 = int_to_ptr.vmem [resolvable:$true] %s164_s7 }
   0xc   :  { %97 = vmatpush.msra.mxu1 %v82_v7  ;;  %v211_v20 = vld [vmem:[%s370_s3] ss:$0 sm:$0xff]  ;;  %s265_s3 = smov 128  }
   0xd   :  { %196 = vmatpush.msra.mxu2 %v82_v7 }
   0xe   :  { %98 = vmatpush.msra.mxu1 %v81_v8 }
   0xf   :  { %197 = vmatpush.msra.mxu2 %v81_v8 }
  0x10   :  { %99 = vmatpush.msra.mxu1 %v80_v9 }
  0x11   :  { %198 = vmatpush.msra.mxu2 %v80_v9 }
  0x12   :  { %100 = vmatpush.msra.mxu1 %v79_v10 }
  0x13   :  { %199 = vmatpush.msra.mxu2 %v79_v10 }
  0x14   :  { %101 = vmatpush.msra.mxu1 %v78_v11 }
  0x15   :  { %200 = vmatpush.msra.mxu2 %v78_v11 }
  0x16   :  { %102 = vmatpush.msra.mxu1 %v77_v12 }
  0x17   :  { %201 = vmatpush.msra.mxu2 %v77_v12 }
  0x18   :  { %103 = vmatpush.msra.mxu1 %v76_v13 }
  0x19   :  { %202 = vmatpush.msra.mxu2 %v76_v13 }
  0x1a   :  { %104 = vmatpush.msra.mxu1 %v75_v14 }
  0x1b   :  { %203 = vmatpush.msra.mxu2 %v75_v14 }
  0x1c   :  { %105 = vmatpush.msra.mxu1 %v74_v15 }
  0x1d   :  { %204 = vmatpush.msra.mxu2 %v74_v15 }
  0x1e   :  { %106 = vmatpush.msra.mxu1 %v73_v16 }
  0x1f   :  { %205 = vmatpush.msra.mxu2 %v73_v16 }
  0x20   :  { %107 = vmatpush.msra.mxu1 %v72_v17 }
  0x21   :  { %206 = vmatpush.msra.mxu2 %v72_v17 }
  0x83   :  { %v58_v18 = vpop.f32.mrf.mxu0 }
  0x84   :  { %108 = vmatmul.f32.vlgmr.msra.gmra.mxu1 %v58_v18 }
  0x8b   :  { %v60_v19 = vpop.f32.mrf.mxu0 }
  0x8c   :  { %111 = vmatmul.f32.vlgmr.msra.gmra.mxu2 %v60_v19 }
 0x101   :  { %v109_v21 = vpop.f32.mrf.mxu1 }
 0x102   :  { %v110_v22 = vadd.f32 %v211_v20, %v109_v21 }
 0x104   :  { %v115_v23 = vmax.f32 %v110_v22, 0.0 }
 0x106   :  { %v118_v24 = vsel %vm117_vm1, %v115_v23, %v58_v18  ;;  %v131_v27 = vmul.f32 %v115_v23, %v115_v23  ;;  %v122_v29 = vsel %vm117_vm1, %v115_v23, 0.0 }
 0x107   :  { %120 = vst [vmem:[#allocation3] sm:$0xff] %v118_v24 }
 0x108   :  { %v133_v34 = vsel %vm117_vm1, %v131_v27, 0.0 }
 0x10f   :  { %v112_v25 = vpop.f32.mrf.mxu2 }
 0x110   :  { %v113_v26 = vadd.f32 %v211_v20, %v112_v25 }
 0x112   :  { %v116_v28 = vmax.f32 %v113_v26, 0.0 }
 0x114   :  { %v119_v30 = vsel %vm117_vm1, %v116_v28, %v60_v19  ;;  %v123_v31 = vsel %vm117_vm1, %v116_v28, 0.0  ;;  %v132_v32 = vmul.f32 %v116_v28, %v116_v28 }
 0x115   :  { %121 = vst [vmem:[#allocation3 + $0x8] sm:$0xff] %v119_v30  ;;  %v124_v33 = vadd.f32 %v123_v31, %v122_v29 }
 0x116   :  { %v134_v35 = vsel %vm117_vm1, %v132_v32, 0.0  ;;  %158 = dma.vmem_to_hbm [thread:$0]  %s151_s2, 256, %s153_s30, [#allocation4], %s265_s3, %s265_s3, %s266_s4  }
 0x117   :  { %v125_v36 = vrot.slane %v124_v33, 4  ;;  %v135_v37 = vadd.f32 %v134_v35, %v133_v34 }
 0x119   :  { %v126_v38 = vadd.f32 %v125_v36, %v124_v33  ;;  %v136_v39 = vrot.slane %v135_v37, 4 }
 0x11b   :  { %v127_v40 = vrot.slane %v126_v38, 2  ;;  %v137_v41 = vadd.f32 %v136_v39, %v135_v37 }
 0x11d   :  { %v128_v42 = vadd.f32 %v127_v40, %v126_v38  ;;  %v138_v43 = vrot.slane %v137_v41, 2 }
 0x11f   :  { %v129_v44 = vrot.slane %v128_v42, 1  ;;  %v139_v45 = vadd.f32 %v138_v43, %v137_v41 }
 0x121   :  { %v140_v46 = vrot.slane %v139_v45, 1  ;;  %v130_v47 = vadd.f32 %v129_v44, %v128_v42 }
 0x123   :  { %v141_v48 = vadd.f32 %v140_v46, %v139_v45 }
 0x125   :  { %v143_v49 = vsel %vm142_vm2, %v130_v47, %v141_v48 }
 0x126   :  { %145 = vst.msk [vmem:[#allocation5] sm:$0x3] %vm144_vm3, %v143_v49 }
 0x127   :  { %169 = dma.vmem_to_hbm [thread:$0]  %s165_s7, 32, %s167_s10, [#allocation6]  }
 0x128   :  { %260 = dma.done.wait [#allocation4], 256  }
 0x129   :  { %261 = vsyncadd [#allocation4], 4294967040 }
 0x12a   :  { %262 = dma.done.wait [#allocation6], 32  }
 0x12b   :  { %263 = vsyncadd [#allocation6], 4294967264 }
 0x12c   :  { %178 = vsyncpa [#allocation4], 1 }
 0x12d   :  { %179 = vsyncpa [#allocation6], 1 }

</bundles_post_ra>
